<compile_context>
chip_gen: v6e
topology: v6e:2x2x1
jax: 0.10.0
libtpu: 0.0.40
codegen_flags: <defaults>
</compile_context>

<pallas_src>
import functools

import jax
import jax.numpy as jnp
from jax.experimental import pallas as pl
from jax.experimental.pallas import tpu as pltpu

LANE = 128  # TPU lane width


def _round_up(n, m):
    return ((n + m - 1) // m) * m


# -----------------------------------------------------------------------------
# Kernels
# -----------------------------------------------------------------------------
def dqn_forward_kernel(x_ref, w1_ref, b1_ref, w2_ref, b2_ref, o_ref):
    # Layer 1: (B, in) @ (in, 256) + (1, 256), ReLU  -> dense vregs
    h = jnp.dot(x_ref[...], w1_ref[...], preferred_element_type=jnp.float32)
    h = jnp.maximum(h + b1_ref[...], 0.0)
    # Layer 2: (B, 256) @ (256, 128) + (1, 128)  -> dense MXU tile, dense store
    out = jnp.dot(h, w2_ref[...], preferred_element_type=jnp.float32)
    o_ref[...] = (out + b2_ref[...]).astype(o_ref.dtype)


def dqn_td_kernel(s_ref, ns_ref, a_ref, r_ref, d_ref,
                  w1_ref, b1_ref, w2_ref, b2_ref,
                  q_ref, loss_ref, *, action_dim, gamma):
    """Fused DQN train-step forward math (matches DQN.train() before backward)."""
    def forward(x):
        h = jnp.dot(x, w1_ref[...], preferred_element_type=jnp.float32)
        h = jnp.maximum(h + b1_ref[...], 0.0)
        return jnp.dot(h, w2_ref[...], preferred_element_type=jnp.float32) + b2_ref[...]

    q = forward(s_ref[...])        # (B, 128) padded Q(s, .)
    q_next = forward(ns_ref[...])  # (B, 128) padded Q(s', .)

    lanes = jax.lax.broadcasted_iota(jnp.int32, q.shape, 1)        # (B, 128)
    valid = lanes < action_dim

    # max over the real action lanes only (padded lanes masked to -big)
    neg_big = jnp.float32(jnp.finfo(jnp.float32).min)
    q_next_max = jnp.max(jnp.where(valid, q_next, neg_big), axis=-1, keepdims=True)  # (B,1)

    # y = r                      if done
    #     r + gamma*max_a Q(s')  otherwise
    y = r_ref[...] + gamma * q_next_max * (1.0 - d_ref[...])        # (B, 1)

    # gather Q(s, a) via one-hot on the lane axis (rides VPU/XLU, no MXU round-trip)
    onehot = (lanes == a_ref[...]).astype(jnp.float32)              # (B, 128)
    y_out = jnp.sum(q * onehot, axis=-1, keepdims=True)             # (B, 1)

    diff = y_out - y                                                # (B, 1)
    batch = jnp.float32(diff.shape[0])
    loss_ref[...] = jnp.sum(diff * diff, axis=0, keepdims=True) / batch  # (1, 1) MSE

    q_ref[...] = q.astype(q_ref.dtype)


# -----------------------------------------------------------------------------
# Wrappers
# -----------------------------------------------------------------------------
def pad_dqn_params(w1, b1, w2, b2):
    """Zero-pad params once: hidden -> multiple of 128 (256), out -> 128."""
    in_dim, hidden = w1.shape
    out_dim = w2.shape[1]
    hp = _round_up(hidden, LANE)
    op = _round_up(out_dim, LANE)
    w1p = jnp.zeros((in_dim, hp), jnp.float32).at[:, :hidden].set(w1)
    b1p = jnp.zeros((1, hp), jnp.float32).at[:, :hidden].set(b1)
    w2p = jnp.zeros((hp, op), jnp.float32).at[:hidden, :out_dim].set(w2)
    b2p = jnp.zeros((1, op), jnp.float32).at[:, :out_dim].set(b2)
    return w1p, b1p, w2p, b2p


def _full_spec(shape):
    # single resident block == full array (no grid), trivially VMEM-resident
    return pl.BlockSpec(shape, lambda: (0,) * len(shape))


def dqn_forward(x, padded_params, out_dim):
    """Pallas forward pass. x: (B, in). Returns (B, out_dim), float32."""
    w1p, b1p, w2p, b2p = padded_params
    B = x.shape[0]
    op = w2p.shape[1]
    out_padded = pl.pallas_call(
        dqn_forward_kernel,
        out_shape=jax.ShapeDtypeStruct((B, op), jnp.float32),
        in_specs=[_full_spec(x.shape), _full_spec(w1p.shape), _full_spec(b1p.shape),
                  _full_spec(w2p.shape), _full_spec(b2p.shape)],
        out_specs=pl.BlockSpec((B, op), lambda: (0, 0)),
    )(x, w1p, b1p, w2p, b2p)
    return out_padded[:, :out_dim]  # free layout plumbing in the wrapper


def dqn_td_step(state, new_state, action, reward, done, padded_params,
                out_dim, gamma=0.9):
    """Fused DQN training-step forward: returns (Q(s) (B,out_dim), mse_loss scalar)."""
    w1p, b1p, w2p, b2p = padded_params
    B = state.shape[0]
    op = w2p.shape[1]
    kernel = functools.partial(dqn_td_kernel, action_dim=out_dim, gamma=gamma)
    q_padded, loss = pl.pallas_call(
        kernel,
        out_shape=(jax.ShapeDtypeStruct((B, op), jnp.float32),
                   jax.ShapeDtypeStruct((1, 1), jnp.float32)),
        in_specs=[_full_spec(state.shape), _full_spec(new_state.shape),
                  _full_spec(action.shape), _full_spec(reward.shape),
                  _full_spec(done.shape),
                  _full_spec(w1p.shape), _full_spec(b1p.shape),
                  _full_spec(w2p.shape), _full_spec(b2p.shape)],
        out_specs=[pl.BlockSpec((B, op), lambda: (0, 0)),
                   pl.BlockSpec((1, 1), lambda: (0, 0))],
    )(state, new_state, action, reward, done, w1p, b1p, w2p, b2p)
    return q_padded[:, :out_dim], loss[0, 0]


# -----------------------------------------------------------------------------
# Init + references
# -----------------------------------------------------------------------------
def init_dqn_params(key, input_size, output_size, hidden=200):
    """Mimics torch.nn.Linear default init (uniform +-1/sqrt(fan_in)); (in,out) layout."""
    k1, k2, k3, k4 = jax.random.split(key, 4)
    bound1 = 1.0 / jnp.sqrt(input_size)
    bound2 = 1.0 / jnp.sqrt(hidden)
    w1 = jax.random.uniform(k1, (input_size, hidden), jnp.float32, -bound1, bound1)
    b1 = jax.random.uniform(k2, (1, hidden), jnp.float32, -bound1, bound1)
    w2 = jax.random.uniform(k3, (hidden, output_size), jnp.float32, -bound2, bound2)
    b2 = jax.random.uniform(k4, (1, output_size), jnp.float32, -bound2, bound2)
    return w1, b1, w2, b2


def dqn_reference(x, w1, b1, w2, b2):
    h = jnp.maximum(x @ w1 + b1, 0.0)
    return h @ w2 + b2


def dqn_td_reference(s, ns, a, r, d, w1, b1, w2, b2, gamma):
    q = dqn_reference(s, w1, b1, w2, b2)
    qn = dqn_reference(ns, w1, b1, w2, b2)
    y = r[:, 0] + gamma * jnp.max(qn, axis=-1) * (1.0 - d[:, 0])
    y_out = jnp.take_along_axis(q, a, axis=1)[:, 0]
    loss = jnp.mean((y_out - y) ** 2)
    return q, loss


# TODO(synk): loss.backward() + Adam step and the host-side replay buffer /
# epsilon-greedy sampling are outside this kernel (autodiff & optimizer state).

if __name__ == "__main__":
    key = jax.random.PRNGKey(0)
    kx, kn, ka, kr, kd, kp = jax.random.split(key, 6)

    # CartPole-like: state_dim=4, action_dim=2, replay minibatch of 16.
    batch = 16
    state_dim = 4
    action_dim = 2
    gamma = 0.9

    x = jax.random.normal(kx, (batch, state_dim), jnp.float32)
    new_x = jax.random.normal(kn, (batch, state_dim), jnp.float32)
    action = jax.random.randint(ka, (batch, 1), 0, action_dim, jnp.int32)
    reward = jax.random.uniform(kr, (batch, 1), jnp.float32)
    done = (jax.random.uniform(kd, (batch, 1), jnp.float32) < 0.25).astype(jnp.float32)

    w1, b1, w2, b2 = init_dqn_params(kp, state_dim, action_dim, hidden=200)
    padded = pad_dqn_params(w1, b1, w2, b2)   # pad once, reuse every call

    # --- forward pass -------------------------------------------------------
    out = jax.block_until_ready(dqn_forward(x, padded, action_dim))
    ref = dqn_reference(x, w1, b1, w2, b2)
    assert out.shape == (batch, action_dim)
    assert out.dtype == jnp.float32
    assert jnp.allclose(out, ref, atol=1e-5, rtol=1e-5)

    # --- fused TD-step forward (one pallas_call for the whole train() math) --
    q_s, loss = dqn_td_step(x, new_x, action, reward, done, padded,
                            action_dim, gamma=gamma)
    q_s = jax.block_until_ready(q_s)
    loss = jax.block_until_ready(loss)
    q_ref, loss_ref = dqn_td_reference(x, new_x, action, reward, done,
                                       w1, b1, w2, b2, gamma)
    assert q_s.shape == (batch, action_dim)
    assert jnp.allclose(q_s, q_ref, atol=1e-5, rtol=1e-5)
    assert jnp.allclose(loss, loss_ref, atol=1e-4, rtol=1e-4)

    print("KERNEL_OK")
</pallas_src>

<mosaic_0001>
module attributes {stable_mosaic.version = 11 : i64} {
  func.func @dqn_forward_kernel(%arg0: memref<16x4xf32, #tpu.memory_space<vmem>>, %arg1: memref<4x256xf32, #tpu.memory_space<vmem>>, %arg2: memref<1x256xf32, #tpu.memory_space<vmem>>, %arg3: memref<256x128xf32, #tpu.memory_space<vmem>>, %arg4: memref<1x128xf32, #tpu.memory_space<vmem>>, %arg5: memref<16x128xf32, #tpu.memory_space<vmem>>) attributes {dimension_semantics = [], scalar_prefetch = 0 : i64, scratch_operands = 0 : i64, tpu.core_type = #tpu.core_type<tc>} {
    %c0 = arith.constant 0 : index
    %c0_0 = arith.constant 0 : index
    %0 = vector.load %arg0[%c0, %c0_0] : memref<16x4xf32, #tpu.memory_space<vmem>>, vector<16x4xf32>
    %c0_1 = arith.constant 0 : index
    %c0_2 = arith.constant 0 : index
    %1 = vector.load %arg1[%c0_1, %c0_2] : memref<4x256xf32, #tpu.memory_space<vmem>>, vector<4x256xf32>
    %cst = arith.constant dense<0.000000e+00> : vector<16x256xf32>
    %2 = tpu.matmul %0, %1, %cst {dimension_numbers = #tpu.dot_dimension_numbers<[1], [0], [0], [1], [0, 0, 1, 1], [], []>} : vector<16x4xf32>, vector<4x256xf32>, vector<16x256xf32> -> vector<16x256xf32>
    %c0_3 = arith.constant 0 : index
    %c0_4 = arith.constant 0 : index
    %3 = vector.load %arg2[%c0_3, %c0_4] : memref<1x256xf32, #tpu.memory_space<vmem>>, vector<1x256xf32>
    %4 = vector.broadcast %3 : vector<1x256xf32> to vector<16x256xf32>
    %5 = arith.addf %2, %4 : vector<16x256xf32>
    %cst_5 = arith.constant 0.000000e+00 : f32
    %6 = vector.broadcast %cst_5 : f32 to vector<16x256xf32>
    %7 = arith.maximumf %5, %6 : vector<16x256xf32>
    %c0_6 = arith.constant 0 : index
    %c0_7 = arith.constant 0 : index
    %8 = vector.load %arg3[%c0_6, %c0_7] : memref<256x128xf32, #tpu.memory_space<vmem>>, vector<256x128xf32>
    %cst_8 = arith.constant dense<0.000000e+00> : vector<16x128xf32>
    %9 = tpu.matmul %7, %8, %cst_8 {dimension_numbers = #tpu.dot_dimension_numbers<[1], [0], [0], [1], [0, 0, 1, 1], [], []>} : vector<16x256xf32>, vector<256x128xf32>, vector<16x128xf32> -> vector<16x128xf32>
    %c0_9 = arith.constant 0 : index
    %c0_10 = arith.constant 0 : index
    %10 = vector.load %arg4[%c0_9, %c0_10] : memref<1x128xf32, #tpu.memory_space<vmem>>, vector<1x128xf32>
    %11 = vector.broadcast %10 : vector<1x128xf32> to vector<16x128xf32>
    %12 = arith.addf %9, %11 : vector<16x128xf32>
    %c0_11 = arith.constant 0 : index
    %c0_12 = arith.constant 0 : index
    %13 = vector.load %arg5[%c0_11, %c0_12] : memref<16x128xf32, #tpu.memory_space<vmem>>, vector<16x128xf32>
    tpu.vector_store %arg5[%c0_11, %c0_12], %12 {strides = array<i32>} : memref<16x128xf32, #tpu.memory_space<vmem>>, vector<16x128xf32>,
    return
  }
}

</mosaic_0001>

<bundles_post_ra>
// kernel: tpu_custom_call.1
= control target key start
LH: loop header
LB: loop body
LE: loop exit
PB: predicated region body
PF: predicated region fallthrough
CT: control target
= control target key end

     0   :  { %10 = vsyncpa [#allocation3], 0  ;;  %s467_s0 = inlined_call_operand.vmem [shape: f32[16,4], index: 0, kind: input, shape index: {}]   ;;  %s468_s1 = inlined_call_operand.vmem [shape: f32[4,256], index: 1, kind: input, shape index: {}]   ;;  %s469_s2 = inlined_call_operand.vmem [shape: f32[1,256], index: 2, kind: input, shape index: {}]   ;;  %s470_s3 = inlined_call_operand.hbm [shape: f32[256,128], index: 3, kind: input, shape index: {}]   ;;  %s471_s4 = inlined_call_operand.vmem [shape: f32[1,128], index: 4, kind: input, shape index: {}]   ;;  %s472_s5 = inlined_call_operand.hbm [shape: f32[16,128], index: 5, kind: output, shape index: {}]  }
   0x1   :  { %11 = vsyncpa [#allocation4], 0  ;;  %s403_s18 = smov [#allocation2]  }
   0x2   :  { %s23_s19 = sshll.u32 %s403_s18, 4  ;;  %s24_s19 = int_to_ptr.vmem [resolvable:$true] %s23_s19 }
   0x3   :  { %s367_s20 = scalar_lea.vmem %s24_s19, 4096  ;;  %p372_p1 = scmp.lt.s32.totalorder %s24_s19, %s24_s19 }
   0x4   :  { %p368_p0 = scmp.ne.s32.totalorder %s24_s19, %s367_s20  ;;  %p373_p2 = scmp.lt.s32.totalorder %s367_s20, %s367_s20 }
   0x6   :  { %p374_p3 = por %p373_p2, %p372_p1 }
   0x8   :  { %p375_p4 = pnand %p374_p3, %p368_p0 }
   0xa   :  { %378 = shalt.err (!%p375_p4)
}
   0xb   :  { %s404_s21 = smov 128   ;;  %s405_s22 = smov 8  }
   0xc   :  { %29 = dma.hbm_to_vmem [thread:$0]  %s470_s3, 4096, %s24_s19, [#allocation3], %s404_s21, %s404_s21, %s405_s22  }
   0xd   :  { %399 = dma.done.wait [#allocation3], 4096  }
   0xe   :  { %400 = vsyncadd [#allocation3], 4294963200  ;;  %v406_v0 = vmov 0.0   ;;  %v37_v1 = vld [vmem:[%s468_s1] sm:$0xff]  ;;  %vm59_vm0 = vcmask 1043456   ;;  %v176_v3 = vld [vmem:[#allocation2 + $0xf8] sm:$0xff]  ;;  %v40_v37 = vlaneseq }
   0xf   :  { %128 = vmatprep.mubr.f32.mxu0 %v406_v0  ;;  %v51_v2 = vcombine.high %v37_v1, %v37_v1  ;;  %v35_v4 = vld [vmem:[%s467_s0] sm:$0xff]  ;;  %vm52_vm1 = vcmask 31744   ;;  %v160_v5 = vld [vmem:[#allocation2 + $0x78] sm:$0xff]  ;;  %321 = vmatprep.subr.mxu1 %v176_v3  ;;  %v175_v6 = vld [vmem:[#allocation2 + $0xf0] sm:$0xff]  ;;  %s407_s6 = smov [#allocation5]  }
  0x10   :  { %337 = vmatpush3.msra.mxu1 %v160_v5  ;;  %v159_v7 = vld [vmem:[#allocation2 + $0x70] sm:$0xff]  ;;  %v36_v8 = vld [vmem:[%s467_s0 + $0x8] sm:$0xff]  ;;  %v173_v11 = vld [vmem:[#allocation2 + $0xe0] sm:$0xff]  ;;  %v41_v38 = vshrl.u32 %v40_v37, 7  ;;  %s266_s7 = sshll.u32 %s407_s6, 4  ;;  %s267_s7 = int_to_ptr.vmem [resolvable:$true] %s266_s7 }
  0x11   :  { %278 = vmatprep.subr.msk.mxu0 %vm59_vm0, %v51_v2  ;;  %322 = vmatprep.subr.mxu1 %v175_v6  ;;  %v174_v9 = vld [vmem:[#allocation2 + $0xe8] sm:$0xff]  ;;  %v157_v12 = vld [vmem:[#allocation2 + $0x60] sm:$0xff]  ;;  %v172_v13 = vld [vmem:[#allocation2 + $0xd8] sm:$0xff]  ;;  %s379_s8 = scalar_lea.vmem %s267_s7, 256  ;;  %p384_p6 = scmp.lt.s32.totalorder %s267_s7, %s267_s7 }
  0x12   :  { %279 = vmatpush1.msk.msra.mxu0 %vm59_vm0, %v37_v1  ;;  %v158_v10 = vld [vmem:[#allocation2 + $0x68] sm:$0xff]  ;;  %338 = vmatpush3.msra.mxu1 %v159_v7  ;;  %v156_v14 = vld [vmem:[#allocation2 + $0x58] sm:$0xff]  ;;  %v171_v15 = vld [vmem:[#allocation2 + $0xd0] sm:$0xff]  ;;  %v42_v39 = vsub.s32 0, %v41_v38  ;;  %v46_v41 = vsub.s32 1, %v41_v38  ;;  %p380_p5 = scmp.ne.s32.totalorder %s267_s7, %s379_s8  ;;  %p385_p7 = scmp.lt.s32.totalorder %s379_s8, %s379_s8 }
  0x13   :  { %280 = vmatmul.mubr.msk.f32.vlgmr.msra.gmra.mxu0 %vm52_vm1, %v35_v4  ;;  %283 = vmatprep.subr.mxu0 %v176_v3  ;;  %v155_v16 = vld [vmem:[#allocation2 + $0x50] sm:$0xff]  ;;  %v170_v17 = vld [vmem:[#allocation2 + $0xc8] sm:$0xff]  ;;  %v169_v19 = vld [vmem:[#allocation2 + $0xc0] sm:$0xff] }
  0x14   :  { %134 = vmatprep.mubr.f32.mxu0 %v406_v0  ;;  %284 = vmatpush3.msra.mxu0 %v160_v5  ;;  %v154_v18 = vld [vmem:[#allocation2 + $0x48] sm:$0xff]  ;;  %v153_v20 = vld [vmem:[#allocation2 + $0x40] sm:$0xff]  ;;  %v168_v21 = vld [vmem:[#allocation2 + $0xb8] sm:$0xff]  ;;  %p386_p8 = por %p385_p7, %p384_p6 }
  0x15   :  { %285 = vmatprep.subr.mxu0 %v175_v6  ;;  %323 = vmatprep.subr.mxu1 %v174_v9  ;;  %v152_v22 = vld [vmem:[#allocation2 + $0x38] sm:$0xff]  ;;  %v167_v23 = vld [vmem:[#allocation2 + $0xb0] sm:$0xff]  ;;  %v166_v25 = vld [vmem:[#allocation2 + $0xa8] sm:$0xff] }
  0x16   :  { %286 = vmatpush3.msra.mxu0 %v159_v7  ;;  %339 = vmatpush3.msra.mxu1 %v158_v10  ;;  %v151_v24 = vld [vmem:[#allocation2 + $0x30] sm:$0xff]  ;;  %v150_v26 = vld [vmem:[#allocation2 + $0x28] sm:$0xff]  ;;  %v165_v27 = vld [vmem:[#allocation2 + $0xa0] sm:$0xff]  ;;  %p387_p9 = pnand %p386_p8, %p380_p5 }
  0x17   :  { %281 = vmatmul.mubr.msk.f32.gmra.mxu0 %vm52_vm1, %v36_v8  ;;  %287 = vmatprep.subr.mxu0 %v174_v9  ;;  %v149_v28 = vld [vmem:[#allocation2 + $0x20] sm:$0xff]  ;;  %v164_v29 = vld [vmem:[#allocation2 + $0x98] sm:$0xff]  ;;  %v163_v31 = vld [vmem:[#allocation2 + $0x90] sm:$0xff] }
  0x18   :  { %288 = vmatpush3.msra.mxu0 %v158_v10  ;;  %324 = vmatprep.subr.mxu1 %v173_v11  ;;  %v148_v30 = vld [vmem:[#allocation2 + $0x18] sm:$0xff]  ;;  %v147_v32 = vld [vmem:[#allocation2 + $0x10] sm:$0xff]  ;;  %v162_v33 = vld [vmem:[#allocation2 + $0x88] sm:$0xff] }
  0x19   :  { %289 = vmatprep.subr.mxu0 %v173_v11  ;;  %340 = vmatpush3.msra.mxu1 %v157_v12  ;;  %v146_v34 = vld [vmem:[#allocation2 + $0x8] sm:$0xff]  ;;  %v161_v35 = vld [vmem:[#allocation2 + $0x80] sm:$0xff] }
  0x1a   :  { %290 = vmatpush3.msra.mxu0 %v157_v12  ;;  %325 = vmatprep.subr.mxu1 %v172_v13  ;;  %v145_v36 = vld [vmem:[#allocation2] sm:$0xff] }
  0x1b   :  { %291 = vmatprep.subr.mxu0 %v172_v13  ;;  %341 = vmatpush3.msra.mxu1 %v156_v14  ;;  %v38_v40 = vld [vmem:[%s469_s2] sm:$0x3] }
  0x1c   :  { %292 = vmatpush3.msra.mxu0 %v156_v14  ;;  %326 = vmatprep.subr.mxu1 %v171_v15  ;;  %v43_v42 = vrot.slane %v38_v40, %v42_v39  ;;  %v47_v43 = vrot.slane %v38_v40, %v46_v41  ;;  %v282_v57 = vld [vmem:[%s471_s4] ss:$0 sm:$0xff] }
  0x1d   :  { %293 = vmatprep.subr.mxu0 %v171_v15  ;;  %342 = vmatpush3.msra.mxu1 %v155_v16 }
  0x1e   :  { %294 = vmatpush3.msra.mxu0 %v155_v16  ;;  %327 = vmatprep.subr.mxu1 %v170_v17 }
  0x1f   :  { %295 = vmatprep.subr.mxu0 %v170_v17  ;;  %343 = vmatpush3.msra.mxu1 %v154_v18 }
  0x20   :  { %296 = vmatpush3.msra.mxu0 %v154_v18  ;;  %328 = vmatprep.subr.mxu1 %v169_v19 }
  0x21   :  { %297 = vmatprep.subr.mxu0 %v169_v19  ;;  %344 = vmatpush3.msra.mxu1 %v153_v20 }
  0x22   :  { %298 = vmatpush3.msra.mxu0 %v153_v20  ;;  %329 = vmatprep.subr.mxu1 %v168_v21 }
  0x23   :  { %299 = vmatprep.subr.mxu0 %v168_v21  ;;  %345 = vmatpush3.msra.mxu1 %v152_v22 }
  0x24   :  { %300 = vmatpush3.msra.mxu0 %v152_v22  ;;  %330 = vmatprep.subr.mxu1 %v167_v23 }
  0x25   :  { %301 = vmatprep.subr.mxu0 %v167_v23  ;;  %346 = vmatpush3.msra.mxu1 %v151_v24 }
  0x26   :  { %302 = vmatpush3.msra.mxu0 %v151_v24  ;;  %331 = vmatprep.subr.mxu1 %v166_v25 }
  0x27   :  { %303 = vmatprep.subr.mxu0 %v166_v25  ;;  %347 = vmatpush3.msra.mxu1 %v150_v26 }
  0x28   :  { %304 = vmatpush3.msra.mxu0 %v150_v26  ;;  %332 = vmatprep.subr.mxu1 %v165_v27 }
  0x29   :  { %305 = vmatprep.subr.mxu0 %v165_v27  ;;  %348 = vmatpush3.msra.mxu1 %v149_v28 }
  0x2a   :  { %306 = vmatpush3.msra.mxu0 %v149_v28  ;;  %333 = vmatprep.subr.mxu1 %v164_v29 }
  0x2b   :  { %307 = vmatprep.subr.mxu0 %v164_v29  ;;  %349 = vmatpush3.msra.mxu1 %v148_v30 }
  0x2c   :  { %308 = vmatpush3.msra.mxu0 %v148_v30  ;;  %334 = vmatprep.subr.mxu1 %v163_v31 }
  0x2d   :  { %309 = vmatprep.subr.mxu0 %v163_v31  ;;  %350 = vmatpush3.msra.mxu1 %v147_v32 }
  0x2e   :  { %310 = vmatpush3.msra.mxu0 %v147_v32  ;;  %335 = vmatprep.subr.mxu1 %v162_v33 }
  0x2f   :  { %311 = vmatprep.subr.mxu0 %v162_v33  ;;  %351 = vmatpush3.msra.mxu1 %v146_v34 }
  0x30   :  { %312 = vmatpush3.msra.mxu0 %v146_v34  ;;  %336 = vmatprep.subr.mxu1 %v161_v35 }
  0x31   :  { %313 = vmatprep.subr.mxu0 %v161_v35  ;;  %352 = vmatpush3.msra.mxu1 %v145_v36 }
  0x32   :  { %314 = vmatpush3.msra.mxu0 %v145_v36 }
  0xd3   :  { %v130_v44 = vpop.f32.mrf.mxu0 }
  0xd4   :  { %v131_v45 = vadd.f32 %v130_v44, %v43_v42 }
  0xd5   :  { %v132_v46 = vpop.f32.mrf.mxu0 }
  0xd6   :  { %v133_v47 = vadd.f32 %v132_v46, %v47_v43  ;;  %v141_v50 = vmax.f32 %v131_v45, 0.0 }
  0xd7   :  { %v136_v48 = vpop.f32.mrf.mxu0 }
  0xd8   :  { %v142_v49 = vmax.f32 %v133_v47, 0.0  ;;  %v137_v51 = vadd.f32 %v136_v48, %v43_v42 }
  0xd9   :  { %v138_v52 = vpop.f32.mrf.mxu0 }
  0xda   :  { %248 = vmatprep.mubr.f32.mxu0 %v142_v49  ;;  %v139_v53 = vadd.f32 %v138_v52, %v47_v43  ;;  %v143_v55 = vmax.f32 %v137_v51, 0.0 }
  0xdb   :  { %249 = vmatmul.mubr.f32.vlgmr.msra.gmra.mxu0 %v141_v50 }
  0xdc   :  { %v144_v54 = vmax.f32 %v139_v53, 0.0 }
  0xde   :  { %253 = vmatprep.mubr.f32.mxu1 %v144_v54 }
  0xdf   :  { %254 = vmatmul.mubr.f32.vlgmr.msra.gmra.mxu1 %v143_v55 }
 0x19b   :  { %v315_v56 = vpop.f32.mrf.mxu0 }
 0x19d   :  { %v316_v58 = vpop.f32.mrf.mxu0 }
 0x19e   :  { %v317_v59 = vadd.f32 %v316_v58, %v315_v56 }
 0x19f   :  { %v318_v60 = vpop.f32.mrf.mxu1 }
 0x1a0   :  { %v251_v61 = vadd.f32 %v317_v59, %v282_v57 }
 0x1a1   :  { %v319_v62 = vpop.f32.mrf.mxu1 }
 0x1a2   :  { %259 = vst [vmem:[#allocation5] sm:$0xff] %v251_v61  ;;  %v320_v63 = vadd.f32 %v319_v62, %v318_v60 }
 0x1a4   :  { %v256_v0 = vadd.f32 %v320_v63, %v282_v57 }
 0x1a6   :  { %260 = vst [vmem:[#allocation5 + $0x8] sm:$0xff] %v256_v0 }
 0x1a7   :  { %390 = shalt.err (!%p387_p9)
}
 0x1a8   :  { %272 = dma.vmem_to_hbm [thread:$0]  %s267_s7, 256, %s472_s5, [#allocation4], %s404_s21, %s404_s21, %s405_s22  }
 0x1a9   :  { %401 = dma.done.wait [#allocation4], 256  }
 0x1aa   :  { %402 = vsyncadd [#allocation4], 4294967040 }
 0x1ab   :  { %276 = vsyncpa [#allocation3], 1 }
 0x1ac   :  { %277 = vsyncpa [#allocation4], 1 }

</bundles_post_ra>
